<compile_context>
chip_gen: v5e
topology: v5e:2x2
jax: 0.10.0
libtpu: 0.0.40
codegen_flags: <defaults>
</compile_context>

<pallas_src>
import jax
import jax.numpy as jnp
from jax import lax
from jax.experimental import pallas as pl
from jax.experimental.pallas import tpu as pltpu

LANE = 128            # lane width (last dim of every vreg)
MAX_TILE_ROWS = 4096  # 4096 x 128 f32 = 2 MiB per input per buffer (sweep up to 8192 on v6e/v7x)
MAX_FOLD = 64         # accumulator sublanes: 8 independent vreg add-chains per tile


def _sublane_rows(dtype):
    """Minimum sublane multiple for a dtype's (rows, 128) tile: 8 (4B), 16 (2B), 32 (1B)."""
    return max(8, 32 // max(1, jnp.dtype(dtype).itemsize))


def visual_hint_loss(pred, gt):
    """Equivalent of VisualHintLoss().forward(pred, gt) -> scalar mean BCE-with-logits loss."""
    p = jnp.squeeze(pred, axis=2)
    assert p.shape == gt.shape, (p.shape, gt.shape)

    n_valid = int(p.size)                      # static at trace time
    row_align = max(_sublane_rows(p.dtype), _sublane_rows(gt.dtype))

    rows = -(-n_valid // LANE)
    rows_aligned = -(-rows // row_align) * row_align
    tile_rows = min(MAX_TILE_ROWS, rows_aligned)
    fold = max(d for d in (MAX_FOLD, 32, 16, 8) if tile_rows % d == 0)

    steps_total = -(-rows_aligned // tile_rows)       # logical blocks covering the data
    num_chunks = 2 if steps_total >= 2 else 1         # lets v7x megacore split the work
    spc = -(-steps_total // num_chunks)               # reduction steps per chunk
    total_blocks = num_chunks * spc                   # may exceed steps_total by 1 (phantom block)

    block_elems = tile_rows * LANE
    full_blocks = n_valid // block_elems              # blocks containing no invalid element
    gen_unmasked = full_blocks > 0
    gen_masked = full_blocks < total_blocks

    # Flatten (free bitcast). Only pad when n_valid is not already a multiple of the
    # (row_align x 128) tile — zero for typical image shapes, so no HBM re-materialization.
    flat_p = p.reshape(-1)
    flat_g = gt.reshape(-1)
    padded = rows_aligned * LANE
    if padded != n_valid:   # pad value irrelevant: tail elements are masked in-kernel
        flat_p = jnp.pad(flat_p, (0, padded - n_valid))
        flat_g = jnp.pad(flat_g, (0, padded - n_valid))
    p2 = flat_p.reshape(rows_aligned, LANE)
    g2 = flat_g.reshape(rows_aligned, LANE)

    if total_blocks == steps_total:
        def in_map(c, i):
            return (c * spc + i, 0)
    else:
        # Odd steps_total split over 2 chunks -> one phantom block; clamp its origin into the
        # array (its contribution is fully masked since its logical element index >= n_valid).
        def in_map(c, i):
            return (jnp.minimum(c * spc + i, steps_total - 1), 0)

    def kernel(pred_ref, gt_ref, out_ref, acc_ref):
        c = pl.program_id(0)
        i = pl.program_id(1)

        @pl.when(i == 0)
        def _():
            acc_ref[...] = jnp.zeros_like(acc_ref)

        x = pred_ref[...].astype(jnp.float32)   # cast in-kernel; inputs stream in native dtype
        y = gt_ref[...].astype(jnp.float32)
        # Numerically stable BCE with logits (matches torch.nn.BCEWithLogitsLoss):
        #   l = max(x, 0) - x*y + log1p(exp(-|x|))
        loss = jnp.maximum(x, 0.0) - x * y + jnp.log1p(jnp.exp(-jnp.abs(x)))

        block = c * spc + i  # logical (un-clamped) block index; spc/tile sizes are static

        if gen_unmasked:
            @pl.when(block < full_blocks)
            def _():
                # Fold sublanes into (fold, 128): `fold` independent vreg add-chains (VPU only).
                acc_ref[...] += loss.reshape(-1, fold, LANE).sum(axis=0)

        if gen_masked:
            @pl.when(block >= full_blocks)
            def _():
                # Ragged-tail / phantom block: zero every element whose global flat index is out
                # of range before folding; garbage from boundary reads is discarded by the select.
                r = lax.broadcasted_iota(jnp.int32, (tile_rows, LANE), 0)
                l = lax.broadcasted_iota(jnp.int32, (tile_rows, LANE), 1)
                gidx = (block * tile_rows + r) * LANE + l
                masked = jnp.where(gidx < n_valid, loss, 0.0)
                acc_ref[...] += masked.reshape(-1, fold, LANE).sum(axis=0)

        @pl.when(i == spc - 1)
        def _():
            # Single deferred cross-lane/cross-sublane reduction; per-chunk partial sum to SMEM.
            out_ref[0, 0] = jnp.sum(acc_ref[...])

    # 3-deep input buffering only pays (and is only requested) with enough steps to pipeline.
    spec_kwargs = {"pipeline_mode": pl.Buffered(3)} if spc >= 3 else {}
    n_bufs = 3 if spc >= 3 else 2
    in_specs = [pl.BlockSpec((tile_rows, LANE), in_map, **spec_kwargs),
                pl.BlockSpec((tile_rows, LANE), in_map, **spec_kwargs)]

    tile_bytes = tile_rows * LANE * (p2.dtype.itemsize + g2.dtype.itemsize)
    vmem_limit = int(min(48 << 20, max(16 << 20, n_bufs * tile_bytes + fold * LANE * 4 + (2 << 20))))

    cost = pl.CostEstimate(
        flops=6 * n_valid,
        transcendentals=2 * n_valid,
        bytes_accessed=p2.size * p2.dtype.itemsize + g2.size * g2.dtype.itemsize + 4 * num_chunks,
    )

    partials = pl.pallas_call(
        kernel,
        out_shape=jax.ShapeDtypeStruct((num_chunks, 1), jnp.float32),
        grid_spec=pltpu.PrefetchScalarGridSpec(
            num_scalar_prefetch=0,
            grid=(num_chunks, spc),
            in_specs=in_specs,
            out_specs=pl.BlockSpec((1, 1), lambda c, i: (c, 0), memory_space=pltpu.SMEM),
            scratch_shapes=[pltpu.VMEM((fold, LANE), jnp.float32)],
        ),
        compiler_params=pltpu.CompilerParams(
            # TODO(synk): on v7x, verify via trace that the chunk axis shards across both
            # TensorCores; if not, switch to (pltpu.CORE_PARALLEL, pltpu.ARBITRARY).
            dimension_semantics=("parallel", "arbitrary"),
            vmem_limit_bytes=vmem_limit,
        ),
        cost_estimate=cost,
    )(p2, g2)

    return jnp.sum(partials) * jnp.float32(1.0 / float(n_valid))


def _reference(pred, gt):
    x = jnp.squeeze(pred, axis=2).astype(jnp.float32)
    y = gt.astype(jnp.float32)
    loss = jnp.maximum(x, 0.0) - x * y + jnp.log1p(jnp.exp(-jnp.abs(x)))
    return jnp.mean(loss)


if __name__ == "__main__":
    key = jax.random.PRNGKey(0)
    k1, k2, k3, k4 = jax.random.split(key, 4)

    # Primary test: pred [B, N, 1, H, W] logits; gt [B, N, H, W] binary targets (lane-aligned).
    B, N, H, W = 2, 4, 16, 16
    pred = jax.random.normal(k1, (B, N, 1, H, W), dtype=jnp.float32) * 2.0
    gt = (jax.random.uniform(k2, (B, N, H, W)) > 0.5).astype(jnp.float32)

    out = jax.block_until_ready(visual_hint_loss(pred, gt))
    ref = jax.block_until_ready(_reference(pred, gt))
    assert jnp.allclose(out, ref, rtol=1e-5, atol=1e-6), (out, ref)

    # Ragged test: element count not a multiple of 128 -> exercises the in-kernel tail mask.
    B2, N2, H2, W2 = 2, 3, 17, 23
    pred2 = jax.random.normal(k3, (B2, N2, 1, H2, W2), dtype=jnp.float32) * 2.0
    gt2 = (jax.random.uniform(k4, (B2, N2, H2, W2)) > 0.5).astype(jnp.float32)

    out2 = jax.block_until_ready(visual_hint_loss(pred2, gt2))
    ref2 = jax.block_until_ready(_reference(pred2, gt2))
    assert jnp.allclose(out2, ref2, rtol=1e-5, atol=1e-6), (out2, ref2)

    print("KERNEL_OK")
</pallas_src>

<mosaic_0001>
module attributes {stable_mosaic.version = 11 : i64} {
  func.func @kernel(%arg0: i32, %arg1: i32, %arg2: memref<16x128xf32, #tpu.memory_space<vmem>>, %arg3: memref<16x128xf32, #tpu.memory_space<vmem>>, %arg4: memref<1x1xf32, #tpu.memory_space<smem>>, %arg5: memref<16x128xf32, #tpu.memory_space<vmem>>) attributes {dimension_semantics = [#tpu.dimension_semantics<parallel>, #tpu.dimension_semantics<arbitrary>], iteration_bounds = array<i64: 1, 1>, scalar_prefetch = 0 : i64, scratch_operands = 1 : i64, tpu.core_type = #tpu.core_type<tc>, window_params = [{transform_indices = @transform_0, window_bounds = array<i64: 16, 128>}, {transform_indices = @transform_1, window_bounds = array<i64: 16, 128>}, {transform_indices = @transform_2, window_bounds = array<i64: 1, 1>}]} {
    %c0_i32 = arith.constant 0 : i32
    %0 = arith.cmpi eq, %arg1, %c0_i32 : i32
    %1 = arith.extui %0 : i1 to i32
    %c0_i32_0 = arith.constant 0 : i32
    %2 = arith.cmpi ne, %1, %c0_i32_0 : i32
    scf.if %2 {
      %cst_9 = arith.constant 0.000000e+00 : f32
      %23 = vector.broadcast %cst_9 : f32 to vector<16x128xf32>
      %c0_10 = arith.constant 0 : index
      %c0_11 = arith.constant 0 : index
      %24 = vector.load %arg5[%c0_10, %c0_11] : memref<16x128xf32, #tpu.memory_space<vmem>>, vector<16x128xf32>
      tpu.vector_store %arg5[%c0_10, %c0_11], %23 {strides = array<i32>} : memref<16x128xf32, #tpu.memory_space<vmem>>, vector<16x128xf32>,
    } else {
    }
    %c0 = arith.constant 0 : index
    %c0_1 = arith.constant 0 : index
    %3 = vector.load %arg2[%c0, %c0_1] : memref<16x128xf32, #tpu.memory_space<vmem>>, vector<16x128xf32>
    %c0_2 = arith.constant 0 : index
    %c0_3 = arith.constant 0 : index
    %4 = vector.load %arg3[%c0_2, %c0_3] : memref<16x128xf32, #tpu.memory_space<vmem>>, vector<16x128xf32>
    %cst = arith.constant 0.000000e+00 : f32
    %5 = vector.broadcast %cst : f32 to vector<16x128xf32>
    %6 = arith.maximumf %3, %5 : vector<16x128xf32>
    %7 = arith.mulf %3, %4 : vector<16x128xf32>
    %8 = arith.subf %6, %7 : vector<16x128xf32>
    %9 = math.absf %3 : vector<16x128xf32>
    %cst_4 = arith.constant 0.000000e+00 : f32
    %10 = vector.broadcast %cst_4 : f32 to vector<16x128xf32>
    %11 = arith.subf %10, %9 : vector<16x128xf32>
    %12 = math.exp %11 : vector<16x128xf32>
    %13 = math.log1p %12 : vector<16x128xf32>
    %14 = arith.addf %8, %13 : vector<16x128xf32>
    %c1_i32 = arith.constant 1 : i32
    %15 = arith.muli %arg0, %c1_i32 : i32
    %16 = arith.addi %15, %arg1 : i32
    %c1_i32_5 = arith.constant 1 : i32
    %17 = arith.cmpi slt, %16, %c1_i32_5 : i32
    %18 = arith.extui %17 : i1 to i32
    %c0_i32_6 = arith.constant 0 : i32
    %19 = arith.cmpi ne, %18, %c0_i32_6 : i32
    scf.if %19 {
      %c0_9 = arith.constant 0 : index
      %c0_10 = arith.constant 0 : index
      %23 = vector.load %arg5[%c0_9, %c0_10] : memref<16x128xf32, #tpu.memory_space<vmem>>, vector<16x128xf32>
      %24 = vector.shape_cast %14 : vector<16x128xf32> to vector<1x16x128xf32>
      %cst_11 = arith.constant dense<0.000000e+00> : vector<16x128xf32>
      %25 = vector.multi_reduction <add>, %24, %cst_11 [0] : vector<1x16x128xf32> to vector<16x128xf32>
      %26 = arith.addf %23, %25 : vector<16x128xf32>
      %c0_12 = arith.constant 0 : index
      %c0_13 = arith.constant 0 : index
      %27 = vector.load %arg5[%c0_12, %c0_13] : memref<16x128xf32, #tpu.memory_space<vmem>>, vector<16x128xf32>
      tpu.vector_store %arg5[%c0_12, %c0_13], %26 {strides = array<i32>} : memref<16x128xf32, #tpu.memory_space<vmem>>, vector<16x128xf32>,
    } else {
    }
    %c0_i32_7 = arith.constant 0 : i32
    %20 = arith.cmpi eq, %arg1, %c0_i32_7 : i32
    %21 = arith.extui %20 : i1 to i32
    %c0_i32_8 = arith.constant 0 : i32
    %22 = arith.cmpi ne, %21, %c0_i32_8 : i32
    scf.if %22 {
      %c0_9 = arith.constant 0 : index
      %c0_10 = arith.constant 0 : index
      %23 = vector.load %arg5[%c0_9, %c0_10] : memref<16x128xf32, #tpu.memory_space<vmem>>, vector<16x128xf32>
      %24 = vector.shape_cast %23 : vector<16x128xf32> to vector<1x16x128xf32>
      %cst_11 = arith.constant dense<0.000000e+00> : vector<1xf32>
      %25 = vector.multi_reduction <add>, %24, %cst_11 [1, 2] : vector<1x16x128xf32> to vector<1xf32>
      %26 = vector.shape_cast %25 : vector<1xf32> to vector<1x1x1xf32>
      %27 = vector.extract %26[0, 0, 0] : f32 from vector<1x1x1xf32>
      %c0_12 = arith.constant 0 : index
      %c0_13 = arith.constant 0 : index
      %28 = memref.load %arg4[%c0_12, %c0_13] : memref<1x1xf32, #tpu.memory_space<smem>>
      memref.store %27, %arg4[%c0_12, %c0_13] : memref<1x1xf32, #tpu.memory_space<smem>>
    } else {
    }
    return
  }
  func.func @transform_0(%arg0: i32, %arg1: i32) -> (i32, i32) {
    %c1_i32 = arith.constant 1 : i32
    %0 = arith.muli %arg0, %c1_i32 : i32
    %1 = arith.addi %0, %arg1 : i32
    %c0_i32 = arith.constant 0 : i32
    %c0_i32_0 = arith.constant 0 : i32
    return %1, %c0_i32 : i32, i32
  }
  func.func @transform_1(%arg0: i32, %arg1: i32) -> (i32, i32) {
    %c1_i32 = arith.constant 1 : i32
    %0 = arith.muli %arg0, %c1_i32 : i32
    %1 = arith.addi %0, %arg1 : i32
    %c0_i32 = arith.constant 0 : i32
    %c0_i32_0 = arith.constant 0 : i32
    return %1, %c0_i32 : i32, i32
  }
  func.func @transform_2(%arg0: i32, %arg1: i32) -> (i32, i32) {
    %c0_i32 = arith.constant 0 : i32
    %c0_i32_0 = arith.constant 0 : i32
    return %arg0, %c0_i32 : i32, i32
  }
}

</mosaic_0001>

<bundles_post_ra>
// kernel: tpu_custom_call.1
= control target key start
LH: loop header
LB: loop body
LE: loop exit
PB: predicated region body
PF: predicated region fallthrough
CT: control target
= control target key end

     0   :  { %7 = vsyncpa [#allocation4], 0  ;;  %s257_s0 = inlined_call_operand.hbm [shape: f32[16,128], index: 0, kind: input, shape index: {}]   ;;  %s258_s1 = inlined_call_operand.hbm [shape: f32[16,128], index: 1, kind: input, shape index: {}]   ;;  %s259_s2 = inlined_call_operand.hbm [shape: f32[1,1], index: 2, kind: output, shape index: {}]  }
   0x1   :  { %8 = vsyncpa [#allocation7], 0 }
   0x2   :  { %9 = vsyncpa [#allocation5], 0  ;;  %s18_s11 = sshll.u32 %s257_s0, 4  ;;  %s228_s12 = smov [#allocation3]   ;;  %s19_s11 = int_to_ptr.hbm [resolvable:$true] %s18_s11 }
   0x3   :  { %s20_s13 = sshll.u32 %s228_s12, 4  ;;  %s35_s16 = sshll.u32 %s258_s1, 4  ;;  %s21_s13 = int_to_ptr.vmem [resolvable:$true] %s20_s13  ;;  %s36_s16 = int_to_ptr.hbm [resolvable:$true] %s35_s16 }
   0x4   :  { %s229_s17 = smov 128   ;;  %s230_s18 = smov 8  }
   0x5   :  { %26 = dma.hbm_to_vmem [thread:$0]  %s19_s11, 256, %s21_s13, [#allocation4], %s229_s17, %s229_s17, %s230_s18  }
   0x6   :  { %s231_s19 = smov [#allocation6]  }
   0x7   :  { %s37_s20 = sshll.u32 %s231_s19, 4  ;;  %s38_s20 = int_to_ptr.vmem [resolvable:$true] %s37_s20 }
   0x8   :  { %43 = dma.hbm_to_vmem [thread:$0]  %s36_s16, 256, %s38_s20, [#allocation7], %s229_s17, %s229_s17, %s230_s18  }
   0x9   :  { %222 = dma.done.wait [#allocation4], 256  }
   0xa   :  { %223 = vsyncadd [#allocation4], 4294967040 }
   0xb   :  { %224 = dma.done.wait [#allocation7], 256  }
   0xc   :  { %225 = vsyncadd [#allocation7], 4294967040  ;;  %v62_v0 = vld [vmem:[#allocation3] sm:$0xff]  ;;  %v63_v1 = vld [vmem:[#allocation3 + $0x8] sm:$0xff]  ;;  %s135_s21 = sshll.u32 %s259_s2, 4  ;;  %s232_s23 = smov [#allocation8]   ;;  %s136_s21 = int_to_ptr.hbm [resolvable:$true] %s135_s21 }
   0xd   :  { %v72_v2 = vand.u32 2147483647, %v62_v0  ;;  %v73_v3 = vand.u32 2147483647, %v63_v1  ;;  %v64_v12 = vld [vmem:[#allocation6] sm:$0xff]  ;;  %v65_v15 = vld [vmem:[#allocation6 + $0x8] sm:$0xff] }
   0xe   :  { %v66_v17 = vmax.f32 %v62_v0, 0.0  ;;  %v68_v18 = vmul.f32 %v64_v12, %v62_v0  ;;  %v67_v21 = vmax.f32 %v63_v1, 0.0  ;;  %v69_v22 = vmul.f32 %v65_v15, %v63_v1 }
   0xf   :  { %v74_v4 = vsub.f32 0.0, %v72_v2  ;;  %v75_v5 = vsub.f32 0.0, %v73_v3 }
  0x10   :  { %v70_v26 = vsub.f32 %v66_v17, %v68_v18  ;;  %v71_v29 = vsub.f32 %v67_v21, %v69_v22 }
  0x11   :  { %v76_v6 = vmul.f32 1.442695, %v74_v4  ;;  %v78_v7 = vmul.f32 1.442695, %v75_v5 }
  0x13   :  { %154 = vpow2.f32 %v76_v6 }
  0x14   :  { %156 = vpow2.f32 %v78_v7 }
  0x19   :  { %v155_v8 = vpop.eup %154 }
  0x1a   :  { %v157_v9 = vpop.eup %156  ;;  %v80_v10 = vadd.f32 1.0, %v155_v8  ;;  %v83_v11 = vmul.f32 -0.5, %v155_v8  ;;  %v86_v19 = vand.u32 2147483647, %v155_v8 }
  0x1b   :  { %v89_v13 = vadd.f32 1.0, %v157_v9  ;;  %v92_v14 = vmul.f32 -0.5, %v157_v9  ;;  %v95_v23 = vand.u32 2147483647, %v157_v9 }
  0x1c   :  { %158 = vlog2.f32 %v80_v10  ;;  %v84_v16 = vadd.f32 1.0, %v83_v11  ;;  %vm87_vm0 = vcmp.lt.f32.partialorder %v86_v19, 0.0004427343 }
  0x1d   :  { %160 = vlog2.f32 %v89_v13  ;;  %v93_v20 = vadd.f32 1.0, %v92_v14  ;;  %vm96_vm1 = vcmp.lt.f32.partialorder %v95_v23, 0.0004427343 }
  0x1e   :  { %v85_v24 = vmul.f32 %v155_v8, %v84_v16 }
  0x1f   :  { %v94_v27 = vmul.f32 %v157_v9, %v93_v20 }
  0x22   :  { %v159_v25 = vpop.eup %158 }
  0x23   :  { %v161_v28 = vpop.eup %160  ;;  %v82_v30 = vmul.f32 0.6931472, %v159_v25 }
  0x24   :  { %v91_v31 = vmul.f32 0.6931472, %v161_v28 }
  0x25   :  { %v88_v32 = vsel %vm87_vm0, %v85_v24, %v82_v30 }
  0x26   :  { %v97_v33 = vsel %vm96_vm1, %v94_v27, %v91_v31  ;;  %v98_v34 = vadd.f32 %v88_v32, %v70_v26 }
  0x27   :  { %v99_v35 = vadd.f32 %v97_v33, %v71_v29 }
  0x29   :  { %v118_v36 = vadd.f32 %v99_v35, %v98_v34 }
  0x2b   :  { %119 = vadd.xlane.f32.xlu0 %v118_v36 }
  0x9e   :  { %v120_v37 = vpop.xlane.xlu0 %119 }
  0x9f   :  { %v121_v38 = vrot.slane %v120_v37, 4 }
  0xa1   :  { %v122_v39 = vadd.f32 %v121_v38, %v120_v37 }
  0xa3   :  { %v123_v40 = vrot.slane %v122_v39, 2 }
  0xa5   :  { %v124_v41 = vadd.f32 %v123_v40, %v122_v39 }
  0xa7   :  { %v125_v42 = vrot.slane %v124_v41, 1 }
  0xa9   :  { %v126_v43 = vadd.f32 %v125_v42, %v124_v41 }
  0xab   :  { %147 = vpush %v126_v43 }
  0xdc   :  { %s148_s22 = spop %147 }
  0xdd   :  { %129 = sst [smem:[#allocation8]] %s148_s22 }
  0xde   :  { %138 = dma.smem_to_hbm %s232_s23, 16, %s136_s21, [#allocation5]  }
  0xdf   :  { %226 = dma.done.wait [#allocation5], 16  }
  0xe0   :  { %227 = vsyncadd [#allocation5], 4294967280 }
  0xe1   :  { %143 = sfence }
  0xe2   :  { %144 = vsyncpa [#allocation4], 1 }
  0xe3   :  { %145 = vsyncpa [#allocation7], 1 }
  0xe4   :  { %146 = vsyncpa [#allocation5], 1 }

</bundles_post_ra>
